<compile_context>
chip_gen: v6e
topology: v6e:2x2x1
jax: 0.10.0
libtpu: 0.0.40
codegen_flags: <defaults>
</compile_context>

<pallas_src>
import jax
import jax.numpy as jnp
from jax.experimental import pallas as pl
from jax.experimental.pallas import tpu as pltpu


def _round_up(v, m):
    return (v + m - 1) // m * m


def bn_ac_conv_kernel(x_ref, scale_ref, bias_ref, w_ref, o_ref):
    # x_ref:     (Cin, TL)   input tile, channels on sublanes, spatial on lanes
    # scale_ref: (Cin, 1)    folded BN scale  = gamma / sqrt(var + eps)
    # bias_ref:  (Cin, 1)    folded BN bias   = beta - mean * scale
    # w_ref:     (Cout, Cin) 1x1x1 conv weight in the MXU dtype (bf16)
    # o_ref:     (Cout, TL)
    h = x_ref[...].astype(jnp.float32) * scale_ref[...] + bias_ref[...]
    h = jnp.maximum(h, 0.0)                                  # ReLU (f32, VPU)
    o_ref[...] = jnp.dot(
        w_ref[...], h.astype(w_ref.dtype),                   # MXU, bf16 in
        preferred_element_type=jnp.float32,                  # f32 accumulate
    ).astype(o_ref.dtype)


def bn_ac_conv3d(x, gamma, beta, running_mean, running_var, conv_w,
                 *, eps=1e-5, max_tl=2048, matmul_dtype=jnp.bfloat16,
                 tile_budget_bytes=24 * 1024 * 1024):
    """x: (N, Cin, D, H, W).  conv_w: (Cout, Cin, 1, 1, 1).  Returns NCDHW."""
    N, Cin, D, H, W = x.shape
    Cout = conv_w.shape[0]
    DHW = D * H * W

    x_isz = jnp.dtype(x.dtype).itemsize
    out_dtype = x.dtype
    o_isz = jnp.dtype(out_dtype).itemsize

    # Fold BN (eval mode) into per-channel scale / bias, shaped (Cin, 1) so
    # they broadcast along the lane (spatial) axis inside the kernel.
    scale_v = (gamma / jnp.sqrt(running_var + eps)).astype(jnp.float32)
    bias_v = (beta - running_mean * scale_v).astype(jnp.float32)
    scale = scale_v.reshape(Cin, 1)
    bias = bias_v.reshape(Cin, 1)

    # 1x1x1 conv weight -> (Cout, Cin) matmul operand in the MXU dtype.
    w_mat = conv_w.reshape(Cout, Cin).astype(matmul_dtype)

    # NCDHW -> (N, Cin, DHW): collapsing trailing contiguous dims is free.
    x3 = x.reshape(N, Cin, DHW)

    # ---- Spatial (lane) tile selection -------------------------------------
    # Biggest multiple of 128 such that double-buffered x + out tiles stay
    # within `tile_budget_bytes`, capped by max_tl and the (padded) problem.
    per_col_bytes = 2 * (Cin * x_isz + Cout * o_isz)          # double-buffered
    tl_budget = max(128, (tile_budget_bytes // max(per_col_bytes, 1))
                    // 128 * 128)
    tl_eff = min(max_tl, tl_budget, _round_up(DHW, 128))
    tl_eff = max(128, (tl_eff // 128) * 128)
    grid = (N, pl.cdiv(DHW, tl_eff))

    # VMEM budget: double-buffered input + output tiles, resident weight and
    # scale/bias, plus headroom.  Clamp into [16 MiB, 48 MiB] so it is valid
    # from v5e through v7x (64 MiB physical).
    vmem_bytes = (
        2 * Cin * tl_eff * x_isz                              # x tiles
        + 2 * Cout * tl_eff * o_isz                           # out tiles
        + 2 * Cout * Cin * jnp.dtype(matmul_dtype).itemsize   # weight
        + 4 * Cin * 4                                         # scale + bias
    )
    vmem_limit = int(min(max(2 * vmem_bytes, 16 * 1024 * 1024),
                         48 * 1024 * 1024))

    out3 = pl.pallas_call(
        bn_ac_conv_kernel,
        out_shape=jax.ShapeDtypeStruct((N, Cout, DHW), out_dtype),
        grid_spec=pltpu.PrefetchScalarGridSpec(
            num_scalar_prefetch=0,
            grid=grid,
            in_specs=[
                # Batch dim squeezed out of the kernel view.
                pl.BlockSpec((pl.Squeezed(), Cin, tl_eff),
                             lambda n, j: (n, 0, j)),
                # Constant index_maps -> resident in VMEM, DMA'd once.
                pl.BlockSpec((Cin, 1), lambda n, j: (0, 0)),
                pl.BlockSpec((Cin, 1), lambda n, j: (0, 0)),
                pl.BlockSpec((Cout, Cin), lambda n, j: (0, 0)),
            ],
            out_specs=pl.BlockSpec((pl.Squeezed(), Cout, tl_eff),
                                   lambda n, j: (n, 0, j)),
        ),
        compiler_params=pltpu.CompilerParams(
            dimension_semantics=("parallel", "parallel"),
            vmem_limit_bytes=vmem_limit),
    )(x3, scale, bias, w_mat)

    # (N, Cout, DHW) -> (N, Cout, D, H, W): free reshape, no transpose.
    return out3.reshape(N, Cout, D, H, W)


def _reference(x, gamma, beta, running_mean, running_var, conv_w, eps=1e-5):
    # Pure-JAX reference of eval-mode BN -> ReLU -> 1x1x1 conv (f32 end-to-end).
    sc = gamma / jnp.sqrt(running_var + eps)
    bs = beta - running_mean * sc
    h = x * sc[None, :, None, None, None] + bs[None, :, None, None, None]
    h = jnp.maximum(h, 0.0)
    w = conv_w.reshape(conv_w.shape[0], conv_w.shape[1])  # (Cout, Cin)
    return jnp.einsum("ncdhw,oc->nodhw", h, w)


if __name__ == "__main__":
    key = jax.random.PRNGKey(0)
    k_x, k_w, k_g, k_b, k_m, k_v = jax.random.split(key, 6)

    N, Cin, D, H, W = 2, 8, 4, 8, 8     # DHW = 256 (2 lane-groups worth)
    Cout = 16

    x = jax.random.normal(k_x, (N, Cin, D, H, W), dtype=jnp.float32)
    conv_w = jax.random.normal(k_w, (Cout, Cin, 1, 1, 1), dtype=jnp.float32) * 0.1
    gamma = 1.0 + 0.1 * jax.random.normal(k_g, (Cin,), dtype=jnp.float32)
    beta = 0.1 * jax.random.normal(k_b, (Cin,), dtype=jnp.float32)
    running_mean = 0.1 * jax.random.normal(k_m, (Cin,), dtype=jnp.float32)
    running_var = jnp.abs(1.0 + 0.1 * jax.random.normal(k_v, (Cin,),
                                                        dtype=jnp.float32))

    out = bn_ac_conv3d(x, gamma, beta, running_mean, running_var, conv_w)
    out = jax.block_until_ready(out)

    ref = _reference(x, gamma, beta, running_mean, running_var, conv_w)
    assert out.shape == (N, Cout, D, H, W)
    # bf16 MXU operands -> loosened tolerance vs. the pure-f32 reference.
    assert jnp.allclose(out, ref, atol=5e-2, rtol=5e-2), float(
        jnp.max(jnp.abs(out - ref)))

    print("KERNEL_OK")
</pallas_src>

<mosaic_0001>
module attributes {stable_mosaic.version = 11 : i64} {
  func.func @bn_ac_conv_kernel(%arg0: i32, %arg1: i32, %arg2: memref<1x8x256xf32, #tpu.memory_space<vmem>>, %arg3: memref<8x1xf32, #tpu.memory_space<vmem>>, %arg4: memref<8x1xf32, #tpu.memory_space<vmem>>, %arg5: memref<16x8xbf16, #tpu.memory_space<vmem>>, %arg6: memref<1x16x256xf32, #tpu.memory_space<vmem>>) attributes {dimension_semantics = [#tpu.dimension_semantics<parallel>, #tpu.dimension_semantics<parallel>], iteration_bounds = array<i64: 2, 1>, scalar_prefetch = 0 : i64, scratch_operands = 0 : i64, tpu.core_type = #tpu.core_type<tc>, window_params = [{transform_indices = @transform_0, window_bounds = array<i64: 1, 8, 256>}, {pipeline_mode = #tpu.pipeline_mode<synchronous>, transform_indices = @transform_1, window_bounds = array<i64: 8, 1>}, {pipeline_mode = #tpu.pipeline_mode<synchronous>, transform_indices = @transform_2, window_bounds = array<i64: 8, 1>}, {pipeline_mode = #tpu.pipeline_mode<synchronous>, transform_indices = @transform_3, window_bounds = array<i64: 16, 8>}, {transform_indices = @transform_4, window_bounds = array<i64: 1, 16, 256>}]} {
    %c0 = arith.constant 0 : index
    %c0_0 = arith.constant 0 : index
    %c0_1 = arith.constant 0 : index
    %0 = vector.load %arg2[%c0, %c0_0, %c0_1] : memref<1x8x256xf32, #tpu.memory_space<vmem>>, vector<1x8x256xf32>
    %1 = vector.shape_cast %0 : vector<1x8x256xf32> to vector<8x256xf32>
    %c0_2 = arith.constant 0 : index
    %c0_3 = arith.constant 0 : index
    %2 = vector.load %arg3[%c0_2, %c0_3] : memref<8x1xf32, #tpu.memory_space<vmem>>, vector<8x1xf32>
    %3 = vector.broadcast %2 : vector<8x1xf32> to vector<8x256xf32>
    %4 = arith.mulf %1, %3 : vector<8x256xf32>
    %c0_4 = arith.constant 0 : index
    %c0_5 = arith.constant 0 : index
    %5 = vector.load %arg4[%c0_4, %c0_5] : memref<8x1xf32, #tpu.memory_space<vmem>>, vector<8x1xf32>
    %6 = vector.broadcast %5 : vector<8x1xf32> to vector<8x256xf32>
    %7 = arith.addf %4, %6 : vector<8x256xf32>
    %cst = arith.constant 0.000000e+00 : f32
    %8 = vector.broadcast %cst : f32 to vector<8x256xf32>
    %9 = arith.maximumf %7, %8 : vector<8x256xf32>
    %c0_6 = arith.constant 0 : index
    %c0_7 = arith.constant 0 : index
    %10 = vector.load %arg5[%c0_6, %c0_7] : memref<16x8xbf16, #tpu.memory_space<vmem>>, vector<16x8xbf16>
    %11 = arith.truncf %9 : vector<8x256xf32> to vector<8x256xbf16>
    %cst_8 = arith.constant dense<0.000000e+00> : vector<16x256xf32>
    %12 = tpu.matmul %10, %11, %cst_8 {dimension_numbers = #tpu.dot_dimension_numbers<[1], [0], [0], [1], [0, 0, 1, 1], [], []>} : vector<16x8xbf16>, vector<8x256xbf16>, vector<16x256xf32> -> vector<16x256xf32>
    %c0_9 = arith.constant 0 : index
    %c0_10 = arith.constant 0 : index
    %c0_11 = arith.constant 0 : index
    %13 = vector.load %arg6[%c0_9, %c0_10, %c0_11] : memref<1x16x256xf32, #tpu.memory_space<vmem>>, vector<1x16x256xf32>
    %14 = vector.shape_cast %13 : vector<1x16x256xf32> to vector<16x256xf32>
    %15 = vector.shape_cast %12 : vector<16x256xf32> to vector<1x16x256xf32>
    tpu.vector_store %arg6[%c0_9, %c0_10, %c0_11], %15 {strides = array<i32>} : memref<1x16x256xf32, #tpu.memory_space<vmem>>, vector<1x16x256xf32>,
    return
  }
  func.func @transform_0(%arg0: i32, %arg1: i32) -> (i32, i32, i32) {
    %c0_i32 = arith.constant 0 : i32
    %c0_i32_0 = arith.constant 0 : i32
    return %arg0, %c0_i32, %arg1 : i32, i32, i32
  }
  func.func @transform_1(%arg0: i32, %arg1: i32) -> (i32, i32) {
    %c0_i32 = arith.constant 0 : i32
    %c0_i32_0 = arith.constant 0 : i32
    %c0_i32_1 = arith.constant 0 : i32
    return %c0_i32, %c0_i32_0 : i32, i32
  }
  func.func @transform_2(%arg0: i32, %arg1: i32) -> (i32, i32) {
    %c0_i32 = arith.constant 0 : i32
    %c0_i32_0 = arith.constant 0 : i32
    %c0_i32_1 = arith.constant 0 : i32
    return %c0_i32, %c0_i32_0 : i32, i32
  }
  func.func @transform_3(%arg0: i32, %arg1: i32) -> (i32, i32) {
    %c0_i32 = arith.constant 0 : i32
    %c0_i32_0 = arith.constant 0 : i32
    %c0_i32_1 = arith.constant 0 : i32
    return %c0_i32, %c0_i32_0 : i32, i32
  }
  func.func @transform_4(%arg0: i32, %arg1: i32) -> (i32, i32, i32) {
    %c0_i32 = arith.constant 0 : i32
    %c0_i32_0 = arith.constant 0 : i32
    return %arg0, %c0_i32, %arg1 : i32, i32, i32
  }
}

</mosaic_0001>

<bundles_post_ra>
// kernel: tpu_custom_call.1
= control target key start
LH: loop header
LB: loop body
LE: loop exit
PB: predicated region body
PF: predicated region fallthrough
CT: control target
= control target key end

     0   :  { %9 = vsyncpa [#allocation3], 0  ;;  %s810_s0 = inlined_call_operand.hbm [shape: f32[2,8,256], index: 0, kind: input, shape index: {}]   ;;  %s811_s1 = inlined_call_operand.vmem [shape: f32[8,1], index: 1, kind: input, shape index: {}]   ;;  %s812_s2 = inlined_call_operand.vmem [shape: f32[8,1], index: 2, kind: input, shape index: {}]   ;;  %s813_s3 = inlined_call_operand.vmem [shape: bf16[16,8], index: 3, kind: input, shape index: {}]   ;;  %s814_s4 = inlined_call_operand.hbm [shape: f32[2,16,256], index: 4, kind: output, shape index: {}]  }
   0x1   :  { %11 = vsyncpa [#allocation3 + $0x1], 0 }
   0x2   :  { %12 = vsyncpa [#allocation4], 0 }
   0x3   :  { %14 = vsyncpa [#allocation4 + $0x1], 0  ;;  %s652_s15 = smov 0   ;;  %s654_s16 = smov 0  }
   0x4   :  { %s656_s17 = smov 0   ;;  %s658_s18 = smov 0  }
   0x5   :  { %s660_s19 = smov 0   ;;  %s662_s20 = smov 0  }
   0x6 LB: > { %s425_s21 = sadd.s32 4294967295, %s620_s20   ;;  %s426_s22 = sadd.s32 4294967294, %s620_s20   ;;  %s620_s20 = sphi %s662_s20, %s20_s20   ;;  %s616_s19 = sphi %s660_s19, %s826_s19   ;;  %s612_s18 = sphi %s658_s18, %s825_s18   ;;  %s608_s17 = sphi %s656_s17, %s824_s17   ;;  %s604_s16 = sphi %s654_s16, %s823_s16   ;;  %s600_s15 = sphi %s652_s15, %s822_s15  }
   0x7   : > { %s32_s23 = sadd.s32 1, %s616_s19  ;;  %s41_s24 = sadd.s32 1, %s608_s17 }
   0x8   : > { %p34_p0 = scmp.ge.s32.totalorder %s32_s23, 2  ;;  %p48_p1 = scmp.ne.s32.totalorder %s608_s17, %s604_s16 }
   0x9   : > { %p49_p2 = scmp.eq.s32.totalorder %s620_s20, 0  ;;  %p54_p3 = scmp.ne.s32.totalorder %s604_s16, %s600_s15 }
   0xa   : > { %s828_s23 = smov (%p34_p0, %s32_s23), 0  ;;  %p55_p5 = scmp.eq.s32.totalorder %s425_s21, 0 }
   0xb   : > { %p693_p4 = por %p49_p2, %p48_p1  ;;  %s36_s26 = ssub.s32 %s616_s19, %s828_s23 }
   0xc   : > { %p143_p6 = scmp.eq.s32.totalorder %s425_s21, 1  ;;  %p39_p7 = scmp.eq.s32.totalorder %s36_s26, 0 }
   0xd   : > { %p699_p8 = por %p55_p5, %p54_p3  ;;  %p149_p10 = scmp.eq.s32.totalorder %s426_s22, 1 }
   0xe   : > { %p703_p9 = por %p143_p6, %p48_p1  ;;  %p457_p13 = scmp.lt.s32.totalorder %s620_s20, 2 }
   0xf   : > { %s708_s29 = scalar_select %p39_p7, %s608_s17, %s41_s24  }
  0x10   : > { %p710_p11 = por %p149_p10, %p54_p3  ;;  %s178_s5 = sand.u32 1, %s608_s17  }
  0x11   : > { %s429_s6 = sshll.u32 %s178_s5, 4  ;;  %s443_s7 = sshll.u32 %s616_s19, 8 }
  0x12   : > { %s818_s30 = scalar_select %p710_p11, 1, 0 }
  0x13   : > { %s190_s10 = scalar_lea.hbm %s810_s0, %s443_s7  ;;  %s182_s11 = scalar_lea.vmem [#allocation2], %s429_s6 }
  0x14   : > { %s192_s12 = sshll.u32 %s182_s11, 4  ;;  %p723_p0 = pnand %p457_p13, %p693_p4  ;;  %s193_s12 = int_to_ptr.vmem [resolvable:$true] %s192_s12 }
  0x15   : > { %p432_p1 = scmp.ge.s32.totalorder %s620_s20, 1  ;;  %p197_p2 = scmp.lt.s32.totalorder %s620_s20, 3 }
  0x16   : > { %s179_s14 = scalar_lea.sflag [#allocation3], %s178_s5  ;;  %p514_p3 = pneg %p723_p0 }
  0x17   : > { %s525_s21 = scalar_lea.vmem %s193_s12, 256  ;;  %s622_s22 = smov [#allocation2]  }
  0x18   : > { %p526_p5 = scmp.ne.s32.totalorder %s193_s12, %s525_s21  ;;  %s530_s24 = sshll.u32 %s622_s22, 4  ;;  %s531_s24 = int_to_ptr.vmem [resolvable:$false] %s530_s24 }
  0x19   : > { %s532_s26 = scalar_lea.vmem %s531_s24, 512  ;;  %p533_p10 = scmp.lt.s32.totalorder %s193_s12, %s531_s24 }
  0x1a   : > { %p528_p6 = pnand %p526_p5, %p514_p3  ;;  %p534_p12 = scmp.lt.s32.totalorder %s532_s26, %s525_s21 }
  0x1c   : > { %p529_p7 = pneg %p528_p6  ;;  %p535_p4 = por %p534_p12, %p533_p10 }
  0x1e   : > { %p536_p13 = pnand %p535_p4, %p529_p7 }
  0x20   : > { %539 = shalt.err (!%p536_p13)
}
  0x21   : > { %452 = dma.hbm_to_vmem [thread:$0]  (!%p723_p0), %s190_s10, 256, %s193_s12, %s179_s14  }
  0x22   : > { %p198_p11 = pnand %p432_p1, %p197_p2 }
  0x23   : > { %s738_s25 = sand.u32 (!%p198_p11), 1, %s604_s16  }
  0x24   : > { %201 = sbr.rel (%p198_p11) target bundleno = 395 (0x18b), region = 36  ;;  %s433_s5 = sshll.u32 (!%p198_p11), %s738_s25, 4 }
  0x25   : > { %s204_s6 = scalar_lea.sflag (!%p198_p11), [#allocation3], %s738_s25  ;;  %s207_s7 = scalar_lea.vmem (!%p198_p11), [#allocation2], %s433_s5 }
  0x29   : > { %591 = dma.done.wait (%p699_p8), %s204_s6, 256  }
  0x2a   : > { %593 = vsyncadd (%p699_p8), %s204_s6, 4294967040  ;;  %v623_v0 = vmov 0   ;;  %v237_v1 = vld [vmem:[%s811_s1] sm:$0xff]  ;;  %v236_v5 = vld [vmem:[%s207_s7 + $0x8] sm:$0xff]  ;;  %vm268_vm0 = vcmask 1043456   ;;  %vm264_vm1 = vcmask 64512  }
  0x2b   : > { %510 = vset.pattern.permute.xlu0 %v623_v0  ;;  %307 = vmatprep.mubr.bf16.mxu0 %v623_v0  ;;  %v245_v2 = vld [vmem:[%s812_s2] sm:$0xff]  ;;  %s434_s13 = sshll.u32 %s738_s25, 5  ;;  %s444_s22 = sshll.u32 %s612_s18, 9 }
  0x2c   : > { %240 = vperm.xlu0 %510, %v237_v1   ;;  %v235_v4 = vld [vmem:[%s207_s7] sm:$0xff]  ;;  %s231_s14 = scalar_lea.vmem [#allocation5], %s434_s13  ;;  %s762_s5 = scalar_lea.hbm %s814_s4, %s444_s22 }
  0x2d   : > { %v511_v16 = vld [vmem:[%s813_s3] sm:$0xff]   ;;  %s338_s21 = sshll.u32 %s231_s14, 4  ;;  %s323_s6 = scalar_lea.sflag [#allocation4], %s738_s25  ;;  %s757_s21 = int_to_ptr.vmem [resolvable:$true] %s338_s21 }
  0x2e   : > { %s540_s7 = scalar_lea.vmem %s757_s21, 512  ;;  %s624_s18 = smov [#allocation5]  }
  0x2f   : > { %p541_p8 = scmp.ne.s32.totalorder %s757_s21, %s540_s7  ;;  %s544_s8 = sshll.u32 %s624_s18, 4  ;;  %s545_s8 = int_to_ptr.vmem [resolvable:$false] %s544_s8 }
  0x30   : > { %248 = vperm.xlu0 %510, %v245_v2   ;;  %s546_s9 = scalar_lea.vmem %s545_s8, 1024  ;;  %p547_p0 = scmp.lt.s32.totalorder %s757_s21, %s545_s8 }
  0x31   : > { %p542_p11 = pnand %p541_p8, %p703_p9  ;;  %p548_p1 = scmp.lt.s32.totalorder %s546_s9, %s540_s7 }
  0x33   : > { %p543_p12 = pneg %p542_p11  ;;  %p549_p2 = por %p548_p1, %p547_p0 }
  0x35   : > { %p550_p3 = pnand %p549_p2, %p543_p12 }
  0xa7   : > { %v241_v3 = vpop.permute.xlu0 %240 }
  0xa8   : > { %v243_v6 = vmul.f32 %v241_v3, %v235_v4  ;;  %v244_v7 = vmul.f32 %v241_v3, %v236_v5 }
  0xab   : > { %v249_v8 = vpop.permute.xlu0 %248 }
  0xac   : > { %v251_v9 = vadd.f32 %v249_v8, %v243_v6  ;;  %v252_v10 = vadd.f32 %v249_v8, %v244_v7 }
  0xae   : > { %v253_v11 = vmax.f32 %v251_v9, 0.0  ;;  %v254_v12 = vmax.f32 %v252_v10, 0.0 }
  0xb0   : > { %v257_v13 = vpack.c.bf16 %v253_v11, %v253_v11  ;;  %v258_v14 = vpack.c.bf16 %v254_v12, %v254_v12 }
  0xb2   : > { %436 = vmatprep.subr.msk.bf16.mxu0 %vm268_vm0, %v258_v14  ;;  %v270_v15 = vsel %vm268_vm0, %v257_v13, 0 }
  0xb3   : > { %290 = vmatpush1.bf16.msra.mxu0 %v270_v15 }
  0xb6   : > { %437 = vmatmul.mubr.msk.bf16.vlgmr.msra.gmra.mxu0 %vm264_vm1, %v511_v16 }
 0x176   : > { %v309_v17 = vpop.f32.mrf.mxu0 }
 0x177   : > { %318 = vst [vmem:[%s231_s14] sm:$0xff] %v309_v17 }
 0x178   : > { %v311_v18 = vpop.f32.mrf.mxu0 }
 0x179   : > { %319 = vst [vmem:[%s231_s14 + $0x8] sm:$0xff] %v311_v18 }
 0x17a   : > { %v313_v19 = vpop.f32.mrf.mxu0 }
 0x17b   : > { %320 = vst [vmem:[%s231_s14 + $0x10] sm:$0xff] %v313_v19 }
 0x17c   : > { %v315_v20 = vpop.f32.mrf.mxu0 }
 0x17d   : > { %321 = vst [vmem:[%s231_s14 + $0x18] sm:$0xff] %v315_v20 }
 0x17e   : > { %553 = shalt.err (!%p550_p3)
}
 0x17f   : > { %s554_s10 = scalar_lea.hbm %s762_s5, 512  ;;  %s558_s12 = scalar_lea.hbm %s814_s4, 1024 }
 0x180   : > { %p555_p5 = scmp.ne.s32.totalorder %s762_s5, %s554_s10  ;;  %p559_p10 = scmp.lt.s32.totalorder %s762_s5, %s814_s4 }
 0x181   : > { %p560_p4 = scmp.lt.s32.totalorder %s558_s12, %s554_s10 }
 0x182   : > { %p556_p6 = pnand %p555_p5, %p703_p9 }
 0x183   : > { %p561_p13 = por %p560_p4, %p559_p10 }
 0x184   : > { %p557_p7 = pneg %p556_p6 }
 0x186   : > { %p562_p8 = pnand %p561_p13, %p557_p7 }
 0x188   : > { %565 = shalt.err (!%p562_p8)
}
 0x189   : > { %s625_s22 = smov 256   ;;  %s626_s24 = smov 16  }
 0x18a   : > { %447 = dma.vmem_to_hbm [thread:$0]  (%p703_p9), %s757_s21, 512, %s762_s5, %s323_s6, %s625_s22, %s625_s22, %s626_s24  }
 0x18b PF: > { %s353_s26 = sand.u32 1, %s600_s15   ;;  %p820_p11 = scmp.ne.s32.totalorder %s818_s30, 0 }
 0x18c   : > { %p821_p12 = scmp.ge.s32.totalorder %s620_s20, 2  ;;  %s354_s7 = scalar_lea.sflag [#allocation4], %s353_s26 }
 0x18e   : > { %p454_p0 = pnand %p821_p12, %p820_p11 }
 0x190   : > { %p455_p1 = pneg %p454_p0 }
 0x192   : > { %595 = dma.done.wait (%p455_p1), %s354_s7, 512  }
 0x193   : > { %597 = vsyncadd (%p455_p1), %s354_s7, 4294966784  ;;  %s20_s20 = sadd.s32 1, %s620_s20   ;;  %s822_s15 = smov %s604_s16 }
 0x194   : > { %p17_p2 = scmp.ge.s32.totalorder %s20_s20, 4   ;;  %s823_s16 = smov %s608_s17 }
 0x195   : > { %s824_s17 = smov %s708_s29  ;;  %s825_s18 = smov %s616_s19 }
 0x196   : > { %s826_s19 = smov %s828_s23  ;;  %19 = sbr.rel (!%p17_p2) target bundleno = 6 (0x6), region = 81 }
 0x19b   :  { %359 = vsyncpa [#allocation3], 1 }
 0x19c   :  { %361 = vsyncpa [#allocation3 + $0x1], 1 }
 0x19d   :  { %362 = vsyncpa [#allocation4], 1 }
 0x19e   :  { %364 = vsyncpa [#allocation4 + $0x1], 1 }

</bundles_post_ra>
